<compile_context>
chip_gen: v7x
topology: tpu7x:2x2x1
jax: 0.10.0
libtpu: 0.0.40
codegen_flags: <defaults>
</compile_context>

<pallas_src>
import jax
import jax.numpy as jnp
from jax import lax
from jax.experimental import pallas as pl
from jax.experimental.pallas import tpu as pltpu


def _round_up(a, b):
    return (a + b - 1) // b * b


def _make_linear_kernel(*, has_bias, tk, d_in, mask_k, mxu_dtype):
    """Build a tiled-matmul kernel: acc += x_tile @ w_tile^T (NT), bias+cast at end."""

    def kernel(x_ref, w_ref, *rest):
        if has_bias:
            b_ref, o_ref, acc_ref = rest
        else:
            o_ref, acc_ref = rest
            b_ref = None

        k = pl.program_id(2)

        @pl.when(k == 0)
        def _():
            acc_ref[...] = jnp.zeros_like(acc_ref)

        x = x_ref[...]          # (tm, tk)
        w = w_ref[...]          # (tn, tk)   -- native (d_out, d_in) layout

        if mask_k:
            # Last K block is partial: zero BOTH operands' overrun columns so the
            # un-DMA'd VMEM garbage (possibly NaN/Inf) contributes exactly 0*0.
            valid = d_in - k * tk                      # >= tk for all but last k
            col = lax.broadcasted_iota(jnp.int32, (1, tk), 1)
            keep = col < valid
            x = jnp.where(keep, x, jnp.zeros((), dtype=x.dtype))
            w = jnp.where(keep, w, jnp.zeros((), dtype=w.dtype))

        if mxu_dtype is not None:
            x = x.astype(mxu_dtype)
            w = w.astype(mxu_dtype)

        # NT matmul on the MXU: contract last dims of both operands.
        acc_ref[...] += lax.dot_general(
            x, w,
            dimension_numbers=(((1,), (1,)), ((), ())),
            preferred_element_type=jnp.float32)

        @pl.when(k == pl.num_programs(2) - 1)
        def _():
            r = acc_ref[...]
            if has_bias:
                r = r + b_ref[...]                     # (1, tn) f32 broadcast
            o_ref[...] = r.astype(o_ref.dtype)

    return kernel


def linear_pallas(x, weight, bias=None, *, tm=512, tn=512, tk=1024,
                  mxu_dtype=None, w_buffers=2, vmem_limit_bytes=None):
    """y = x @ weight.T (+ bias). x: (..., d_in), weight: (d_out, d_in)."""
    d_out, d_in_w = weight.shape
    d_in = x.shape[-1]
    if d_in_w != d_in:
        raise ValueError(f"weight {weight.shape} incompatible with x[..., {d_in}]")

    lead = x.shape[:-1]
    x2 = x.reshape(-1, d_in)
    M = x2.shape[0]
    has_bias = bias is not None

    # --- tile sizing (no HBM copies of x or W; ragged edges handled by partial
    #     boundary blocks + in-kernel K masking) ---
    sub = 16 if x2.dtype == jnp.bfloat16 else 8        # sublane minimum
    if M < tm:
        tm = _round_up(M, sub)
    else:
        tm = _round_up(tm, sub)
    if d_out <= tn:
        tn = d_out                                     # block == full dim: always legal
    else:
        tn = _round_up(tn, 128)                        # lane-aligned when tiling d_out
    if d_in <= tk:
        tk = d_in                                      # single K block, exact
    else:
        tk = _round_up(tk, 128)
    mask_k = (d_in % tk) != 0

    grid = (pl.cdiv(M, tm), pl.cdiv(d_out, tn), pl.cdiv(d_in, tk))
    # NOTE: on v7x, grid[0]*grid[1] >= 2 is needed for both TensorCores to get work;
    # for tiny single-tile layers splitting further would not pay off.

    # --- specs ---
    x_spec = pl.BlockSpec((tm, tk), lambda i, j, k: (i, k))
    if w_buffers == 2:
        w_spec = pl.BlockSpec((tn, tk), lambda i, j, k: (j, k))
    else:
        # Deeper buffering on the dominant (weight) stream for bandwidth-bound calls.
        w_spec = pl.BlockSpec((tn, tk), lambda i, j, k: (j, k),
                              pipeline_mode=pl.Buffered(w_buffers))

    in_specs = [x_spec, w_spec]
    args = [x2, weight]
    if has_bias:
        b2 = bias.astype(jnp.float32).reshape(1, d_out)    # O(d_out) bytes, negligible
        in_specs.append(pl.BlockSpec((1, tn), lambda i, j, k: (0, j)))
        args.append(b2)

    # --- VMEM budget: actual multi-buffered footprint + headroom ---
    if vmem_limit_bytes is None:
        isz = x2.dtype.itemsize
        wsz = weight.dtype.itemsize
        footprint = (2 * tm * tk * isz                     # x double-buffer
                     + max(2, w_buffers) * tn * tk * wsz   # weight buffers
                     + 2 * tm * tn * isz                   # output double-buffer
                     + tm * tn * 4                         # f32 accumulator
                     + (2 * tn * 4 if has_bias else 0))
        vmem_limit_bytes = min(128 << 20, max(32 << 20, footprint + (8 << 20)))

    flops = 2 * M * d_out * d_in
    bytes_accessed = (x2.size * x2.dtype.itemsize
                      + weight.size * weight.dtype.itemsize
                      + M * d_out * x2.dtype.itemsize
                      + (d_out * 4 if has_bias else 0))

    kernel = _make_linear_kernel(has_bias=has_bias, tk=tk, d_in=d_in,
                                 mask_k=mask_k, mxu_dtype=mxu_dtype)

    out = pl.pallas_call(
        kernel,
        out_shape=jax.ShapeDtypeStruct((M, d_out), x2.dtype),
        grid_spec=pltpu.PrefetchScalarGridSpec(
            num_scalar_prefetch=0,
            grid=grid,
            in_specs=in_specs,
            out_specs=pl.BlockSpec((tm, tn), lambda i, j, k: (i, j)),
            scratch_shapes=[pltpu.VMEM((tm, tn), jnp.float32)],
        ),
        compiler_params=pltpu.CompilerParams(
            dimension_semantics=("parallel", "parallel", "arbitrary"),
            vmem_limit_bytes=int(vmem_limit_bytes)),
        cost_estimate=pl.CostEstimate(flops=flops, transcendentals=0,
                                      bytes_accessed=int(bytes_accessed)),
    )(*args)

    return out.reshape(*lead, d_out)


def init_linear_params(key, d_in, d_out, bias=True, dtype=jnp.float32):
    """Parameters matching the PyTorch module's __init__:
    weight (d_out, d_in) ~ xavier_normal (std = sqrt(2/(d_in+d_out))),
    bias (d_out,) ~ U(-1/sqrt(d_in), 1/sqrt(d_in)) (nn.Linear default)."""
    kw, kb = jax.random.split(key)
    std = (2.0 / (d_in + d_out)) ** 0.5
    weight = (jax.random.normal(kw, (d_out, d_in), dtype=jnp.float32) * std).astype(dtype)
    if bias:
        bound = 1.0 / (d_in ** 0.5)
        b = jax.random.uniform(
            kb, (d_out,), minval=-bound, maxval=bound, dtype=jnp.float32
        ).astype(dtype)
    else:
        b = None
    return weight, b


if __name__ == "__main__":
    key = jax.random.PRNGKey(0)
    k1, k2, k3, k4, k5 = jax.random.split(key, 5)

    # --- Test 1: canonical small shape with bias (batch=2, seq=8, d_in=32, d_out=64).
    batch, seq, d_in, d_out = 2, 8, 32, 64
    x = jax.random.normal(k1, (batch, seq, d_in), dtype=jnp.float32)
    w, b = init_linear_params(k2, d_in, d_out, bias=True)
    y = jax.block_until_ready(linear_pallas(x, w, b))
    y_ref = x @ w.T + b
    assert y.shape == (batch, seq, d_out)
    assert jnp.allclose(y, y_ref, atol=1e-4, rtol=1e-4)

    # --- Test 2: ragged M (15 rows), ragged K vs tk (d_in=200, tk=128 -> masked last
    # K block), no bias. Exercises partial boundary blocks with zero padding/copies.
    d_in2, d_out2 = 200, 96
    x2 = jax.random.normal(k3, (3, 5, d_in2), dtype=jnp.float32)
    w2, _ = init_linear_params(k4, d_in2, d_out2, bias=False)
    y2 = jax.block_until_ready(linear_pallas(x2, w2, None, tk=128))
    y2_ref = x2 @ w2.T
    assert y2.shape == (3, 5, d_out2)
    assert jnp.allclose(y2, y2_ref, atol=2e-3, rtol=2e-3)

    # --- Test 3: multi-tile grid (3 x 3 x 2) with bias, small absolute size.
    d_in3, d_out3 = 256, 384
    x3 = jax.random.normal(k5, (2, 96, d_in3), dtype=jnp.float32)
    w3, b3 = init_linear_params(k2, d_in3, d_out3, bias=True)
    y3 = jax.block_until_ready(linear_pallas(x3, w3, b3, tm=64, tn=128, tk=128))
    y3_ref = x3 @ w3.T + b3
    assert y3.shape == (2, 96, d_out3)
    assert jnp.allclose(y3, y3_ref, atol=2e-3, rtol=2e-3)

    # --- Test 4: bf16-MXU option (f32 in/out, bf16 MXU operands, f32 accumulator).
    y4 = jax.block_until_ready(linear_pallas(x, w, b, mxu_dtype=jnp.bfloat16))
    assert jnp.allclose(y4, y_ref, atol=3e-2, rtol=3e-2)

    # --- Test 5: native bf16 activations/weights (16-sublane tiling path).
    xb = x.astype(jnp.bfloat16)
    wb, bb = w.astype(jnp.bfloat16), b.astype(jnp.bfloat16)
    y5 = jax.block_until_ready(linear_pallas(xb, wb, bb))
    assert y5.dtype == jnp.bfloat16
    assert jnp.allclose(y5.astype(jnp.float32), y_ref, atol=5e-2, rtol=5e-2)

    print("KERNEL_OK")
</pallas_src>

<mosaic_0001>
module attributes {stable_mosaic.version = 11 : i64} {
  func.func @kernel(%arg0: i32, %arg1: i32, %arg2: i32, %arg3: memref<16x32xf32, #tpu.memory_space<vmem>>, %arg4: memref<64x32xf32, #tpu.memory_space<vmem>>, %arg5: memref<1x64xf32, #tpu.memory_space<vmem>>, %arg6: memref<16x64xf32, #tpu.memory_space<vmem>>, %arg7: memref<16x64xf32, #tpu.memory_space<vmem>>) attributes {dimension_semantics = [#tpu.dimension_semantics<parallel>, #tpu.dimension_semantics<parallel>, #tpu.dimension_semantics<arbitrary>], iteration_bounds = array<i64: 1, 1, 1>, scalar_prefetch = 0 : i64, scratch_operands = 1 : i64, tpu.core_type = #tpu.core_type<tc>, window_params = [{transform_indices = @transform_0, window_bounds = array<i64: 16, 32>}, {transform_indices = @transform_1, window_bounds = array<i64: 64, 32>}, {transform_indices = @transform_2, window_bounds = array<i64: 1, 64>}, {transform_indices = @transform_3, window_bounds = array<i64: 16, 64>}]} {
    %c0_i32 = arith.constant 0 : i32
    %0 = arith.cmpi eq, %arg2, %c0_i32 : i32
    %1 = arith.extui %0 : i1 to i32
    %c0_i32_0 = arith.constant 0 : i32
    %2 = arith.cmpi ne, %1, %c0_i32_0 : i32
    scf.if %2 {
      %cst_10 = arith.constant 0.000000e+00 : f32
      %12 = vector.broadcast %cst_10 : f32 to vector<16x64xf32>
      %c0_11 = arith.constant 0 : index
      %c0_12 = arith.constant 0 : index
      %13 = vector.load %arg7[%c0_11, %c0_12] : memref<16x64xf32, #tpu.memory_space<vmem>>, vector<16x64xf32>
      tpu.vector_store %arg7[%c0_11, %c0_12], %12 {strides = array<i32>} : memref<16x64xf32, #tpu.memory_space<vmem>>, vector<16x64xf32>,
    } else {
    }
    %c0 = arith.constant 0 : index
    %c0_1 = arith.constant 0 : index
    %3 = vector.load %arg3[%c0, %c0_1] : memref<16x32xf32, #tpu.memory_space<vmem>>, vector<16x32xf32>
    %c0_2 = arith.constant 0 : index
    %c0_3 = arith.constant 0 : index
    %4 = vector.load %arg4[%c0_2, %c0_3] : memref<64x32xf32, #tpu.memory_space<vmem>>, vector<64x32xf32>
    %c0_4 = arith.constant 0 : index
    %c0_5 = arith.constant 0 : index
    %5 = vector.load %arg7[%c0_4, %c0_5] : memref<16x64xf32, #tpu.memory_space<vmem>>, vector<16x64xf32>
    %cst = arith.constant dense<0.000000e+00> : vector<16x64xf32>
    %6 = tpu.matmul %3, %4, %cst {dimension_numbers = #tpu.dot_dimension_numbers<[1], [1], [0], [0], [0, 0, 1, 0], [], []>} : vector<16x32xf32>, vector<64x32xf32>, vector<16x64xf32> -> vector<16x64xf32>
    %7 = arith.addf %5, %6 : vector<16x64xf32>
    %c0_6 = arith.constant 0 : index
    %c0_7 = arith.constant 0 : index
    %8 = vector.load %arg7[%c0_6, %c0_7] : memref<16x64xf32, #tpu.memory_space<vmem>>, vector<16x64xf32>
    tpu.vector_store %arg7[%c0_6, %c0_7], %7 {strides = array<i32>} : memref<16x64xf32, #tpu.memory_space<vmem>>, vector<16x64xf32>,
    %c0_i32_8 = arith.constant 0 : i32
    %9 = arith.cmpi eq, %arg2, %c0_i32_8 : i32
    %10 = arith.extui %9 : i1 to i32
    %c0_i32_9 = arith.constant 0 : i32
    %11 = arith.cmpi ne, %10, %c0_i32_9 : i32
    scf.if %11 {
      %c0_10 = arith.constant 0 : index
      %c0_11 = arith.constant 0 : index
      %12 = vector.load %arg7[%c0_10, %c0_11] : memref<16x64xf32, #tpu.memory_space<vmem>>, vector<16x64xf32>
      %c0_12 = arith.constant 0 : index
      %c0_13 = arith.constant 0 : index
      %13 = vector.load %arg5[%c0_12, %c0_13] : memref<1x64xf32, #tpu.memory_space<vmem>>, vector<1x64xf32>
      %14 = vector.broadcast %13 : vector<1x64xf32> to vector<16x64xf32>
      %15 = arith.addf %12, %14 : vector<16x64xf32>
      %c0_14 = arith.constant 0 : index
      %c0_15 = arith.constant 0 : index
      %16 = vector.load %arg6[%c0_14, %c0_15] : memref<16x64xf32, #tpu.memory_space<vmem>>, vector<16x64xf32>
      tpu.vector_store %arg6[%c0_14, %c0_15], %15 {strides = array<i32>} : memref<16x64xf32, #tpu.memory_space<vmem>>, vector<16x64xf32>,
    } else {
    }
    return
  }
  func.func @transform_0(%arg0: i32, %arg1: i32, %arg2: i32) -> (i32, i32) {
    %c0_i32 = arith.constant 0 : i32
    return %arg0, %arg2 : i32, i32
  }
  func.func @transform_1(%arg0: i32, %arg1: i32, %arg2: i32) -> (i32, i32) {
    %c0_i32 = arith.constant 0 : i32
    return %arg1, %arg2 : i32, i32
  }
  func.func @transform_2(%arg0: i32, %arg1: i32, %arg2: i32) -> (i32, i32) {
    %c0_i32 = arith.constant 0 : i32
    %c0_i32_0 = arith.constant 0 : i32
    return %c0_i32, %arg1 : i32, i32
  }
  func.func @transform_3(%arg0: i32, %arg1: i32, %arg2: i32) -> (i32, i32) {
    %c0_i32 = arith.constant 0 : i32
    return %arg0, %arg1 : i32, i32
  }
}

</mosaic_0001>

<bundles_post_ra>
// kernel: tpu_custom_call.1
= control target key start
LH: loop header
LB: loop body
LE: loop exit
PB: predicated region body
PF: predicated region fallthrough
CT: control target
= control target key end

     0   :  { %vm34_vm0 = vcmask 261120   ;;  %vm19_vm1 = vcmask 523264   ;;  %v269_v6 = vmov 0.0   ;;  %s368_s0 = inlined_call_operand.vmem [shape: f32[16,32], index: 0, kind: input, shape index: {}]   ;;  %s369_s1 = inlined_call_operand.vmem [shape: f32[64,32], index: 1, kind: input, shape index: {}]   ;;  %s370_s2 = inlined_call_operand.vmem [shape: f32[1,64], index: 2, kind: input, shape index: {}]   ;;  %s371_s3 = inlined_call_operand.hbm [shape: f32[16,64], index: 3, kind: output, shape index: {}]  }
   0x1   :  { %v24_v0 = vld [vmem:[%s369_s1] sm:$0xff]  ;;  %v25_v1 = vld [vmem:[%s369_s1 + $0x8] sm:$0xff]  ;;  %v26_v2 = vld [vmem:[%s369_s1 + $0x10] sm:$0xff]  ;;  %21 = vst.msk [vmem:[#allocation2 + $0x8] sm:$0xff] %vm19_vm1, %v269_v6 }
   0x2   :  { %v217_v3 = vpack.c.bf16 %v25_v1, %v24_v0  ;;  %vm304_vm2 = vmpackc.low %vm34_vm0, %vm34_vm0  ;;  %v27_v5 = vld [vmem:[%s369_s1 + $0x18] sm:$0xff]  ;;  %20 = vst.msk [vmem:[#allocation2] sm:$0xff] %vm19_vm1, %v269_v6  ;;  %v22_v8 = vld [vmem:[%s368_s0] sm:$0xff] }
   0x3   :  { %v223_v7 = vpack.c.bf16 %v27_v5, %v26_v2 }
   0x4   :  { %219 = vmatprep.subr.msk.bf16.mxu0 %vm304_vm2, %v217_v3 }
   0x5   :  { %8 = vsyncpa [#allocation4], 0  ;;  %222 = vmatpush3.bf16.xpose.msk.msra.mxu0 %vm304_vm2, %v217_v3  ;;  %214 = vmatprep.mubr.msk.f32.mxu0 %vm34_vm0, %v22_v8  ;;  %v28_v9 = vld [vmem:[%s369_s1 + $0x20] sm:$0xff]  ;;  %v29_v10 = vld [vmem:[%s369_s1 + $0x28] sm:$0xff]  ;;  %s270_s6 = smov [#allocation3]  }
   0x6   :  { %225 = vmatprep.subr.msk.bf16.mxu0 %vm304_vm2, %v223_v7  ;;  %v229_v11 = vpack.c.bf16 %v29_v10, %v28_v9  ;;  %v30_v12 = vld [vmem:[%s369_s1 + $0x30] sm:$0xff]  ;;  %v31_v13 = vld [vmem:[%s369_s1 + $0x38] sm:$0xff]  ;;  %v23_v15 = vld [vmem:[%s368_s0 + $0x8] sm:$0xff]  ;;  %s166_s7 = sshll.u32 %s270_s6, 4  ;;  %s167_s7 = int_to_ptr.vmem [resolvable:$true] %s166_s7 }
   0x7   :  { %v235_v14 = vpack.c.bf16 %v31_v13, %v30_v12  ;;  %v187_v22 = vld [vmem:[%s370_s2] ss:$0 sm:$0xff]  ;;  %s245_s0 = scalar_lea.vmem %s167_s7, 256  ;;  %p250_p1 = scmp.lt.s32.totalorder %s167_s7, %s167_s7 }
   0x8   :  { %v33_v16 = vld [vmem:[#allocation2 + $0x8] sm:$0xff]  ;;  %p246_p0 = scmp.ne.s32.totalorder %s167_s7, %s245_s0  ;;  %p251_p2 = scmp.lt.s32.totalorder %s245_s0, %s245_s0 }
   0x9   :  { %v32_v17 = vld [vmem:[#allocation2] sm:$0xff] }
   0xa   :  { %p252_p3 = por %p251_p2, %p250_p1 }
   0xc   :  { %p253_p4 = pnand %p252_p3, %p246_p0 }
   0xd   :  { %228 = vmatpush3.bf16.xpose.msk.msra.mxu0 %vm304_vm2, %v223_v7 }
   0xe   :  { %231 = vmatprep.subr.msk.bf16.mxu0 %vm304_vm2, %v229_v11 }
  0x15   :  { %234 = vmatpush3.bf16.xpose.msk.msra.mxu0 %vm304_vm2, %v229_v11 }
  0x16   :  { %237 = vmatprep.subr.msk.bf16.mxu0 %vm304_vm2, %v235_v14 }
  0x1d   :  { %240 = vmatpush3.bf16.xpose.msk.msra.mxu0 %vm304_vm2, %v235_v14 }
  0x24   :  { %215 = vmatmul.mubr.msk.f32.vlgmr.msra.gmra.mrb[0].mxu0 %vm34_vm0, %v23_v15 }
  0xf7   :  { %v216_v18 = vpop.f32.mrb[0].mxu0 }
  0xf8   :  { %v141_v19 = vadd.f32 %v216_v18, %v33_v16  ;;  %v131_v20 = vpop.f32.mrb[1].mxu0 }
  0xf9   :  { %v140_v21 = vadd.f32 %v131_v20, %v32_v17 }
  0xfa   :  { %144 = vst.msk [vmem:[#allocation2 + $0x8] sm:$0xff] %vm19_vm1, %v141_v19 }
  0xfb   :  { %143 = vst.msk [vmem:[#allocation2] sm:$0xff] %vm19_vm1, %v140_v21 }
 0x101   :  { %v149_v23 = vld [vmem:[#allocation2 + $0x8] sm:$0xff] }
 0x102   :  { %v148_v24 = vld [vmem:[#allocation2] sm:$0xff]  ;;  %v158_v25 = vadd.f32 %v187_v22, %v149_v23 }
 0x103   :  { %v157_v26 = vadd.f32 %v187_v22, %v148_v24 }
 0x104   :  { %160 = vst.msk [vmem:[#allocation3 + $0x8] sm:$0xff] %vm19_vm1, %v158_v25 }
 0x105   :  { %159 = vst.msk [vmem:[#allocation3] sm:$0xff] %vm19_vm1, %v157_v26 }
 0x106   :  { %256 = shalt.err (!%p253_p4)
}
 0x107   :  { %s257_s9 = scalar_lea.hbm %s371_s3, 256 }
 0x108   :  { %p258_p5 = scmp.ne.s32.totalorder %s371_s3, %s257_s9  ;;  %p261_p6 = scmp.lt.u32.totalorder %s257_s9, %s371_s3 }
 0x10a   :  { %p263_p7 = pnand %p261_p6, %p258_p5 }
 0x10c   :  { %266 = shalt.err (!%p263_p7)
}
 0x10d   :  { %s271_s14 = smov 128   ;;  %s272_s15 = smov 8  }
 0x10e   :  { %172 = dma.vmem_to_hbm [thread:$0]  %s167_s7, 256, %s371_s3, [#allocation4], %s271_s14, %s271_s14, %s272_s15  }
 0x10f   :  { %267 = dma.done.wait [#allocation4], 256  }
 0x110   :  { %268 = vsyncadd [#allocation4], 4294967040 }
 0x111   :  { %176 = vsyncpa [#allocation4], 1 }

</bundles_post_ra>
